<compile_context>
chip_gen: v7x
topology: tpu7x:2x2x1
jax: 0.10.0
libtpu: 0.0.40
codegen_flags: <defaults>
</compile_context>

<pallas_src>
import functools

import jax
import jax.numpy as jnp
from jax.experimental import pallas as pl
from jax.experimental.pallas import tpu as pltpu

LN_EPS = 1e-5
LANE = 128


def _round_up(x, m):
    return (x + m - 1) // m * m


def _head_kernel(s_ref, g_ref,
                 gs_ref, bs_ref,        # ln_seq gamma/beta    [1, D]
                 gg_ref, bg_ref,        # ln_graph gamma/beta  [1, D]
                 wd_ref, bd_ref,        # dense  W [D, H], b [1, H]
                 wo_ref, bo_ref,        # out_proj W [H, Cp], b [1, Cp] (lane padded)
                 out_ref,               # [TB, Cp]
                 *, seq_coff, graph_coff):
    s = s_ref[...].astype(jnp.float32)   # [TB, D]
    g = g_ref[...].astype(jnp.float32)   # [TB, D]

    def layernorm(x, gamma, beta):
        # Fused stats: one pass over x for E[x] and E[x^2].
        inv_d = jnp.float32(1.0 / x.shape[-1])
        mu = jnp.sum(x, axis=-1, keepdims=True) * inv_d
        ex2 = jnp.sum(x * x, axis=-1, keepdims=True) * inv_d
        var = jnp.maximum(ex2 - mu * mu, 0.0)
        return (x - mu) * jax.lax.rsqrt(var + LN_EPS) * gamma + beta

    s = layernorm(s, gs_ref[...], bs_ref[...])
    g = layernorm(g, gg_ref[...], bg_ref[...])

    # Eval-mode dropnet coefficients; skip the multiply when they are exactly 1.0.
    if seq_coff != 1.0:
        s = s * jnp.float32(seq_coff)
    if graph_coff != 1.0:
        g = g * jnp.float32(graph_coff)
    x = s + g

    # dense + activation (tanh)  -- TODO(synk): activation_fn is configurable in fairseq;
    # tanh is the classification-head default and is what is implemented here.
    x = jnp.dot(x, wd_ref[...], preferred_element_type=jnp.float32) + bd_ref[...]
    x = jnp.tanh(x)

    # out_proj (lane-padded to Cp)
    x = jnp.dot(x, wo_ref[...], preferred_element_type=jnp.float32) + bo_ref[...]
    out_ref[...] = x.astype(out_ref.dtype)


def two_input_classification_head(seq, graph, params, *,
                                  seq_coff=1.0, graph_coff=1.0, block_b=512):
    """seq: [B, T, D], graph: [Tg, B, D] -> [B, C]  (eval-mode forward)."""
    B, _, D = seq.shape
    H = params["wd"].shape[1]
    C = params["wo"].shape[1]
    assert params["wd"].shape[0] == D, (
        "LayerNorm(inner_dim) before dense requires input_dim == inner_dim")

    # Slice the single needed token OUTSIDE the kernel: kernel sees only [B, D].
    s = seq[:, -1, :]    # [B, D]
    g = graph[0]         # [B, D]

    # Batch tile: largest multiple of 8 that keeps double-buffered tiles well in VMEM.
    TB = min(block_b, _round_up(B, 8))
    while TB > 8 and 4 * (2 * 2 * TB * D) > (16 << 20):
        TB //= 2
    TB = max(8, _round_up(TB, 8))
    Bp = _round_up(B, TB)

    # Lane-dense output: pad classes to a multiple of 128.
    Cp = _round_up(C, LANE)

    if Bp != B:
        pad = Bp - B
        s = jnp.pad(s, ((0, pad), (0, 0)))
        g = jnp.pad(g, ((0, pad), (0, 0)))
    wo, bo = params["wo"], params["bo"]
    if Cp != C:
        wo = jnp.pad(wo, ((0, 0), (0, Cp - C)))
        bo = jnp.pad(bo, ((0, 0), (0, Cp - C)))

    n_tiles = Bp // TB

    tile_spec = lambda shape: pl.BlockSpec(shape, lambda i: (i, 0))   # tiled over batch
    const_spec = lambda shape: pl.BlockSpec(shape, lambda i: (0, 0))  # resident params

    in_specs = [
        tile_spec((TB, D)),     # s
        tile_spec((TB, D)),     # g
        const_spec((1, D)),     # ln_seq gamma
        const_spec((1, D)),     # ln_seq beta
        const_spec((1, D)),     # ln_graph gamma
        const_spec((1, D)),     # ln_graph beta
        const_spec((D, H)),     # dense W
        const_spec((1, H)),     # dense b
        const_spec((H, Cp)),    # out_proj W (padded)
        const_spec((1, Cp)),    # out_proj b (padded)
    ]
    out_spec = tile_spec((TB, Cp))

    # Rough VMEM budget: double-buffered activation/output tiles + resident weights.
    vmem_est = 4 * (2 * (2 * TB * D + TB * Cp) + D * H + H * Cp + 4 * D + H + Cp)
    vmem_limit = int(min(max(4 * vmem_est, 8 << 20), 64 << 20))

    cost = pl.CostEstimate(
        flops=int(2 * Bp * (D * H + H * Cp) + 12 * Bp * D),
        transcendentals=int(Bp * (H + 2)),
        bytes_accessed=int(4 * (2 * Bp * D + D * H + H * Cp + 4 * D + H + Cp + Bp * Cp)),
    )

    kernel = functools.partial(_head_kernel,
                               seq_coff=float(seq_coff),
                               graph_coff=float(graph_coff))

    out = pl.pallas_call(
        kernel,
        out_shape=jax.ShapeDtypeStruct((Bp, Cp), jnp.float32),
        grid=(n_tiles,),
        in_specs=in_specs,
        out_specs=out_spec,
        compiler_params=pltpu.CompilerParams(
            dimension_semantics=("parallel",),   # v7x: shard batch tiles across both TCs
            vmem_limit_bytes=vmem_limit,
        ),
        cost_estimate=cost,
    )(s, g,
      params["gs"], params["bs"],
      params["gg"], params["bg"],
      params["wd"], params["bd"],
      wo, bo)

    return out[:B, :C]


def _reference(seq, graph, p, seq_coff=1.0, graph_coff=1.0):
    def ln(x, g, b):
        mu = jnp.mean(x, -1, keepdims=True)
        var = jnp.mean((x - mu) ** 2, -1, keepdims=True)
        return (x - mu) / jnp.sqrt(var + LN_EPS) * g + b
    s = ln(seq[:, -1, :], p["gs"][0], p["bs"][0])
    g = ln(graph[0], p["gg"][0], p["bg"][0])
    x = s * seq_coff + g * graph_coff
    x = jnp.tanh(x @ p["wd"] + p["bd"][0])
    return x @ p["wo"] + p["bo"][0]


if __name__ == "__main__":
    B, T, Tg = 2, 8, 5
    input_dim = inner_dim = 32   # LayerNorm(inner_dim) applied before dense => must match
    num_classes = 4

    key = jax.random.PRNGKey(0)
    k_seq, k_graph, k_wd, k_bd, k_wo, k_bo = jax.random.split(key, 6)

    seq = jax.random.normal(k_seq, (B, T, input_dim), dtype=jnp.float32)
    graph = jax.random.normal(k_graph, (Tg, B, input_dim), dtype=jnp.float32)

    params = {
        # LayerNorm params (torch default init: gamma=1, beta=0)
        "gs": jnp.ones((1, input_dim), jnp.float32),
        "bs": jnp.zeros((1, input_dim), jnp.float32),
        "gg": jnp.ones((1, input_dim), jnp.float32),
        "bg": jnp.zeros((1, input_dim), jnp.float32),
        # dense: Linear(input_dim, inner_dim); stored transposed as [D, H]
        "wd": jax.random.normal(k_wd, (input_dim, inner_dim), jnp.float32) * 0.05,
        "bd": jax.random.normal(k_bd, (1, inner_dim), jnp.float32) * 0.05,
        # out_proj: Linear(inner_dim, num_classes); stored transposed as [H, C]
        "wo": jax.random.normal(k_wo, (inner_dim, num_classes), jnp.float32) * 0.05,
        "bo": jax.random.normal(k_bo, (1, num_classes), jnp.float32) * 0.05,
    }

    out = two_input_classification_head(seq, graph, params,
                                        seq_coff=1.0, graph_coff=1.0)
    out = jax.block_until_ready(out)

    ref = _reference(seq, graph, params)
    assert out.shape == (B, num_classes)
    assert jnp.allclose(out, ref, atol=1e-5, rtol=1e-5), "mismatch vs reference"

    print("KERNEL_OK")
</pallas_src>

<mosaic_0001>
module attributes {stable_mosaic.version = 11 : i64} {
  func.func @_head_kernel(%arg0: i32, %arg1: memref<8x32xf32, #tpu.memory_space<vmem>>, %arg2: memref<8x32xf32, #tpu.memory_space<vmem>>, %arg3: memref<1x32xf32, #tpu.memory_space<vmem>>, %arg4: memref<1x32xf32, #tpu.memory_space<vmem>>, %arg5: memref<1x32xf32, #tpu.memory_space<vmem>>, %arg6: memref<1x32xf32, #tpu.memory_space<vmem>>, %arg7: memref<32x32xf32, #tpu.memory_space<vmem>>, %arg8: memref<1x32xf32, #tpu.memory_space<vmem>>, %arg9: memref<32x128xf32, #tpu.memory_space<vmem>>, %arg10: memref<1x128xf32, #tpu.memory_space<vmem>>, %arg11: memref<8x128xf32, #tpu.memory_space<vmem>>) attributes {dimension_semantics = [#tpu.dimension_semantics<parallel>], iteration_bounds = array<i64: 1>, scalar_prefetch = 0 : i64, scratch_operands = 0 : i64, tpu.core_type = #tpu.core_type<tc>, window_params = [{transform_indices = @transform_0, window_bounds = array<i64: 8, 32>}, {transform_indices = @transform_1, window_bounds = array<i64: 8, 32>}, {pipeline_mode = #tpu.pipeline_mode<synchronous>, transform_indices = @transform_2, window_bounds = array<i64: 1, 32>}, {pipeline_mode = #tpu.pipeline_mode<synchronous>, transform_indices = @transform_3, window_bounds = array<i64: 1, 32>}, {pipeline_mode = #tpu.pipeline_mode<synchronous>, transform_indices = @transform_4, window_bounds = array<i64: 1, 32>}, {pipeline_mode = #tpu.pipeline_mode<synchronous>, transform_indices = @transform_5, window_bounds = array<i64: 1, 32>}, {pipeline_mode = #tpu.pipeline_mode<synchronous>, transform_indices = @transform_6, window_bounds = array<i64: 32, 32>}, {pipeline_mode = #tpu.pipeline_mode<synchronous>, transform_indices = @transform_7, window_bounds = array<i64: 1, 32>}, {pipeline_mode = #tpu.pipeline_mode<synchronous>, transform_indices = @transform_8, window_bounds = array<i64: 32, 128>}, {pipeline_mode = #tpu.pipeline_mode<synchronous>, transform_indices = @transform_9, window_bounds = array<i64: 1, 128>}, {transform_indices = @transform_10, window_bounds = array<i64: 8, 128>}]} {
    %c0 = arith.constant 0 : index
    %c0_0 = arith.constant 0 : index
    %0 = vector.load %arg1[%c0, %c0_0] : memref<8x32xf32, #tpu.memory_space<vmem>>, vector<8x32xf32>
    %c0_1 = arith.constant 0 : index
    %c0_2 = arith.constant 0 : index
    %1 = vector.load %arg2[%c0_1, %c0_2] : memref<8x32xf32, #tpu.memory_space<vmem>>, vector<8x32xf32>
    %c0_3 = arith.constant 0 : index
    %c0_4 = arith.constant 0 : index
    %2 = vector.load %arg3[%c0_3, %c0_4] : memref<1x32xf32, #tpu.memory_space<vmem>>, vector<1x32xf32>
    %c0_5 = arith.constant 0 : index
    %c0_6 = arith.constant 0 : index
    %3 = vector.load %arg4[%c0_5, %c0_6] : memref<1x32xf32, #tpu.memory_space<vmem>>, vector<1x32xf32>
    %cst = arith.constant dense<0.000000e+00> : vector<8xf32>
    %4 = vector.multi_reduction <add>, %0, %cst [1] : vector<8x32xf32> to vector<8xf32>
    %5 = vector.shape_cast %4 : vector<8xf32> to vector<8x1xf32>
    %cst_7 = arith.constant 3.125000e-02 : f32
    %6 = vector.broadcast %cst_7 : f32 to vector<8x1xf32>
    %7 = arith.mulf %5, %6 : vector<8x1xf32>
    %8 = arith.mulf %0, %0 : vector<8x32xf32>
    %cst_8 = arith.constant dense<0.000000e+00> : vector<8xf32>
    %9 = vector.multi_reduction <add>, %8, %cst_8 [1] : vector<8x32xf32> to vector<8xf32>
    %10 = vector.shape_cast %9 : vector<8xf32> to vector<8x1xf32>
    %cst_9 = arith.constant 3.125000e-02 : f32
    %11 = vector.broadcast %cst_9 : f32 to vector<8x1xf32>
    %12 = arith.mulf %10, %11 : vector<8x1xf32>
    %13 = arith.mulf %7, %7 : vector<8x1xf32>
    %14 = arith.subf %12, %13 : vector<8x1xf32>
    %cst_10 = arith.constant 0.000000e+00 : f32
    %15 = vector.broadcast %cst_10 : f32 to vector<8x1xf32>
    %16 = arith.maximumf %14, %15 : vector<8x1xf32>
    %17 = vector.broadcast %7 : vector<8x1xf32> to vector<8x32xf32>
    %18 = arith.subf %0, %17 : vector<8x32xf32>
    %cst_11 = arith.constant 9.99999974E-6 : f32
    %19 = vector.broadcast %cst_11 : f32 to vector<8x1xf32>
    %20 = arith.addf %16, %19 : vector<8x1xf32>
    %21 = math.rsqrt %20 : vector<8x1xf32>
    %22 = vector.broadcast %21 : vector<8x1xf32> to vector<8x32xf32>
    %23 = arith.mulf %18, %22 : vector<8x32xf32>
    %24 = vector.broadcast %2 : vector<1x32xf32> to vector<8x32xf32>
    %25 = arith.mulf %23, %24 : vector<8x32xf32>
    %26 = vector.broadcast %3 : vector<1x32xf32> to vector<8x32xf32>
    %27 = arith.addf %25, %26 : vector<8x32xf32>
    %c0_12 = arith.constant 0 : index
    %c0_13 = arith.constant 0 : index
    %28 = vector.load %arg5[%c0_12, %c0_13] : memref<1x32xf32, #tpu.memory_space<vmem>>, vector<1x32xf32>
    %c0_14 = arith.constant 0 : index
    %c0_15 = arith.constant 0 : index
    %29 = vector.load %arg6[%c0_14, %c0_15] : memref<1x32xf32, #tpu.memory_space<vmem>>, vector<1x32xf32>
    %cst_16 = arith.constant dense<0.000000e+00> : vector<8xf32>
    %30 = vector.multi_reduction <add>, %1, %cst_16 [1] : vector<8x32xf32> to vector<8xf32>
    %31 = vector.shape_cast %30 : vector<8xf32> to vector<8x1xf32>
    %cst_17 = arith.constant 3.125000e-02 : f32
    %32 = vector.broadcast %cst_17 : f32 to vector<8x1xf32>
    %33 = arith.mulf %31, %32 : vector<8x1xf32>
    %34 = arith.mulf %1, %1 : vector<8x32xf32>
    %cst_18 = arith.constant dense<0.000000e+00> : vector<8xf32>
    %35 = vector.multi_reduction <add>, %34, %cst_18 [1] : vector<8x32xf32> to vector<8xf32>
    %36 = vector.shape_cast %35 : vector<8xf32> to vector<8x1xf32>
    %cst_19 = arith.constant 3.125000e-02 : f32
    %37 = vector.broadcast %cst_19 : f32 to vector<8x1xf32>
    %38 = arith.mulf %36, %37 : vector<8x1xf32>
    %39 = arith.mulf %33, %33 : vector<8x1xf32>
    %40 = arith.subf %38, %39 : vector<8x1xf32>
    %cst_20 = arith.constant 0.000000e+00 : f32
    %41 = vector.broadcast %cst_20 : f32 to vector<8x1xf32>
    %42 = arith.maximumf %40, %41 : vector<8x1xf32>
    %43 = vector.broadcast %33 : vector<8x1xf32> to vector<8x32xf32>
    %44 = arith.subf %1, %43 : vector<8x32xf32>
    %cst_21 = arith.constant 9.99999974E-6 : f32
    %45 = vector.broadcast %cst_21 : f32 to vector<8x1xf32>
    %46 = arith.addf %42, %45 : vector<8x1xf32>
    %47 = math.rsqrt %46 : vector<8x1xf32>
    %48 = vector.broadcast %47 : vector<8x1xf32> to vector<8x32xf32>
    %49 = arith.mulf %44, %48 : vector<8x32xf32>
    %50 = vector.broadcast %28 : vector<1x32xf32> to vector<8x32xf32>
    %51 = arith.mulf %49, %50 : vector<8x32xf32>
    %52 = vector.broadcast %29 : vector<1x32xf32> to vector<8x32xf32>
    %53 = arith.addf %51, %52 : vector<8x32xf32>
    %54 = arith.addf %27, %53 : vector<8x32xf32>
    %c0_22 = arith.constant 0 : index
    %c0_23 = arith.constant 0 : index
    %55 = vector.load %arg7[%c0_22, %c0_23] : memref<32x32xf32, #tpu.memory_space<vmem>>, vector<32x32xf32>
    %cst_24 = arith.constant dense<0.000000e+00> : vector<8x32xf32>
    %56 = tpu.matmul %54, %55, %cst_24 {dimension_numbers = #tpu.dot_dimension_numbers<[1], [0], [0], [1], [0, 0, 1, 1], [], []>} : vector<8x32xf32>, vector<32x32xf32>, vector<8x32xf32> -> vector<8x32xf32>
    %c0_25 = arith.constant 0 : index
    %c0_26 = arith.constant 0 : index
    %57 = vector.load %arg8[%c0_25, %c0_26] : memref<1x32xf32, #tpu.memory_space<vmem>>, vector<1x32xf32>
    %58 = vector.broadcast %57 : vector<1x32xf32> to vector<8x32xf32>
    %59 = arith.addf %56, %58 : vector<8x32xf32>
    %60 = math.tanh %59 : vector<8x32xf32>
    %c0_27 = arith.constant 0 : index
    %c0_28 = arith.constant 0 : index
    %61 = vector.load %arg9[%c0_27, %c0_28] : memref<32x128xf32, #tpu.memory_space<vmem>>, vector<32x128xf32>
    %cst_29 = arith.constant dense<0.000000e+00> : vector<8x128xf32>
    %62 = tpu.matmul %60, %61, %cst_29 {dimension_numbers = #tpu.dot_dimension_numbers<[1], [0], [0], [1], [0, 0, 1, 1], [], []>} : vector<8x32xf32>, vector<32x128xf32>, vector<8x128xf32> -> vector<8x128xf32>
    %c0_30 = arith.constant 0 : index
    %c0_31 = arith.constant 0 : index
    %63 = vector.load %arg10[%c0_30, %c0_31] : memref<1x128xf32, #tpu.memory_space<vmem>>, vector<1x128xf32>
    %64 = vector.broadcast %63 : vector<1x128xf32> to vector<8x128xf32>
    %65 = arith.addf %62, %64 : vector<8x128xf32>
    %c0_32 = arith.constant 0 : index
    %c0_33 = arith.constant 0 : index
    %66 = vector.load %arg11[%c0_32, %c0_33] : memref<8x128xf32, #tpu.memory_space<vmem>>, vector<8x128xf32>
    tpu.vector_store %arg11[%c0_32, %c0_33], %65 {strides = array<i32>} : memref<8x128xf32, #tpu.memory_space<vmem>>, vector<8x128xf32>,
    return
  }
  func.func @transform_0(%arg0: i32) -> (i32, i32) {
    %c0_i32 = arith.constant 0 : i32
    %c0_i32_0 = arith.constant 0 : i32
    return %arg0, %c0_i32 : i32, i32
  }
  func.func @transform_1(%arg0: i32) -> (i32, i32) {
    %c0_i32 = arith.constant 0 : i32
    %c0_i32_0 = arith.constant 0 : i32
    return %arg0, %c0_i32 : i32, i32
  }
  func.func @transform_2(%arg0: i32) -> (i32, i32) {
    %c0_i32 = arith.constant 0 : i32
    %c0_i32_0 = arith.constant 0 : i32
    %c0_i32_1 = arith.constant 0 : i32
    return %c0_i32, %c0_i32_0 : i32, i32
  }
  func.func @transform_3(%arg0: i32) -> (i32, i32) {
    %c0_i32 = arith.constant 0 : i32
    %c0_i32_0 = arith.constant 0 : i32
    %c0_i32_1 = arith.constant 0 : i32
    return %c0_i32, %c0_i32_0 : i32, i32
  }
  func.func @transform_4(%arg0: i32) -> (i32, i32) {
    %c0_i32 = arith.constant 0 : i32
    %c0_i32_0 = arith.constant 0 : i32
    %c0_i32_1 = arith.constant 0 : i32
    return %c0_i32, %c0_i32_0 : i32, i32
  }
  func.func @transform_5(%arg0: i32) -> (i32, i32) {
    %c0_i32 = arith.constant 0 : i32
    %c0_i32_0 = arith.constant 0 : i32
    %c0_i32_1 = arith.constant 0 : i32
    return %c0_i32, %c0_i32_0 : i32, i32
  }
  func.func @transform_6(%arg0: i32) -> (i32, i32) {
    %c0_i32 = arith.constant 0 : i32
    %c0_i32_0 = arith.constant 0 : i32
    %c0_i32_1 = arith.constant 0 : i32
    return %c0_i32, %c0_i32_0 : i32, i32
  }
  func.func @transform_7(%arg0: i32) -> (i32, i32) {
    %c0_i32 = arith.constant 0 : i32
    %c0_i32_0 = arith.constant 0 : i32
    %c0_i32_1 = arith.constant 0 : i32
    return %c0_i32, %c0_i32_0 : i32, i32
  }
  func.func @transform_8(%arg0: i32) -> (i32, i32) {
    %c0_i32 = arith.constant 0 : i32
    %c0_i32_0 = arith.constant 0 : i32
    %c0_i32_1 = arith.constant 0 : i32
    return %c0_i32, %c0_i32_0 : i32, i32
  }
  func.func @transform_9(%arg0: i32) -> (i32, i32) {
    %c0_i32 = arith.constant 0 : i32
    %c0_i32_0 = arith.constant 0 : i32
    %c0_i32_1 = arith.constant 0 : i32
    return %c0_i32, %c0_i32_0 : i32, i32
  }
  func.func @transform_10(%arg0: i32) -> (i32, i32) {
    %c0_i32 = arith.constant 0 : i32
    %c0_i32_0 = arith.constant 0 : i32
    return %arg0, %c0_i32 : i32, i32
  }
}

</mosaic_0001>

<bundles_post_ra>
// kernel: tpu_custom_call.1
= control target key start
LH: loop header
LB: loop body
LE: loop exit
PB: predicated region body
PF: predicated region fallthrough
CT: control target
= control target key end

     0   :  { %15 = vsyncpa [#allocation3], 0  ;;  %s677_s0 = inlined_call_operand.hbm [shape: f32[8,32], index: 0, kind: input, shape index: {}]   ;;  %s678_s1 = inlined_call_operand.hbm [shape: f32[8,32], index: 1, kind: input, shape index: {}]   ;;  %s679_s2 = inlined_call_operand.vmem [shape: f32[1,32], index: 2, kind: input, shape index: {}]   ;;  %s680_s3 = inlined_call_operand.vmem [shape: f32[1,32], index: 3, kind: input, shape index: {}]   ;;  %s681_s4 = inlined_call_operand.vmem [shape: f32[1,32], index: 4, kind: input, shape index: {}]   ;;  %s682_s5 = inlined_call_operand.vmem [shape: f32[1,32], index: 5, kind: input, shape index: {}]   ;;  %s683_s6 = inlined_call_operand.hbm [shape: f32[32,32], index: 6, kind: input, shape index: {}]   ;;  %s684_s7 = inlined_call_operand.vmem [shape: f32[1,32], index: 7, kind: input, shape index: {}]   ;;  %s685_s8 = inlined_call_operand.hbm [shape: f32[32,128], index: 8, kind: input, shape index: {}]   ;;  %s686_s9 = inlined_call_operand.vmem [shape: f32[1,128], index: 9, kind: input, shape index: {}]   ;;  %s687_s10 = inlined_call_operand.hbm [shape: f32[8,128], index: 10, kind: output, shape index: {}]  }
   0x1   :  { %16 = vsyncpa [#allocation6], 0 }
   0x2   :  { %17 = vsyncpa [#allocation9], 0 }
   0x3   :  { %18 = vsyncpa [#allocation4], 0  ;;  %s528_s13 = smov [#allocation5]   ;;  %s529_s15 = smov [#allocation2]  }
   0x4   :  { %s35_s14 = sshll.u32 %s528_s13, 4  ;;  %s25_s16 = sshll.u32 %s529_s15, 4  ;;  %s36_s14 = int_to_ptr.vmem [resolvable:$true] %s35_s14  ;;  %s26_s16 = int_to_ptr.vmem [resolvable:$true] %s25_s16 }
   0x5   :  { %s410_s19 = scalar_lea.hbm %s678_s1, 128 }
   0x6   :  { %p411_p0 = scmp.ne.s32.totalorder %s678_s1, %s410_s19  ;;  %p414_p1 = scmp.lt.u32.totalorder %s410_s19, %s678_s1 }
   0x8   :  { %p416_p2 = pnand %p414_p1, %p411_p0 }
   0xa   :  { %419 = shalt.err (!%p416_p2)
}
   0xb   :  { %s420_s24 = scalar_lea.vmem %s36_s14, 128  ;;  %p425_p4 = scmp.lt.s32.totalorder %s36_s14, %s36_s14 }
   0xc   :  { %p421_p3 = scmp.ne.s32.totalorder %s36_s14, %s420_s24  ;;  %p426_p5 = scmp.lt.s32.totalorder %s420_s24, %s420_s24 }
   0xe   :  { %p427_p6 = por %p426_p5, %p425_p4 }
  0x10   :  { %p428_p7 = pnand %p427_p6, %p421_p3 }
  0x12   :  { %431 = shalt.err (!%p428_p7)
}
  0x13   :  { %38 = dma.hbm_to_vmem [thread:$0]  %s678_s1, 128, %s36_s14, [#allocation6]  }
  0x14   :  { %s432_s29 = scalar_lea.hbm %s677_s0, 128 }
  0x15   :  { %p433_p8 = scmp.ne.s32.totalorder %s677_s0, %s432_s29  ;;  %p436_p9 = scmp.lt.u32.totalorder %s432_s29, %s677_s0 }
  0x17   :  { %p438_p10 = pnand %p436_p9, %p433_p8 }
  0x19   :  { %441 = shalt.err (!%p438_p10)
}
  0x1a   :  { %s442_s15 = scalar_lea.vmem %s26_s16, 128  ;;  %p447_p12 = scmp.lt.s32.totalorder %s26_s16, %s26_s16 }
  0x1b   :  { %p443_p11 = scmp.ne.s32.totalorder %s26_s16, %s442_s15  ;;  %p448_p13 = scmp.lt.s32.totalorder %s442_s15, %s442_s15 }
  0x1d   :  { %p449_p0 = por %p448_p13, %p447_p12 }
  0x1f   :  { %p450_p1 = pnand %p449_p0, %p443_p11 }
  0x21   :  { %453 = shalt.err (!%p450_p1)
}
  0x22   :  { %28 = dma.hbm_to_vmem [thread:$0]  %s677_s0, 128, %s26_s16, [#allocation3]  }
  0x23   :  { %s530_s17 = smov [#allocation7]   ;;  %s454_s21 = scalar_lea.hbm %s683_s6, 512 }
  0x24   :  { %s52_s18 = sshll.u32 %s530_s17, 4  ;;  %p455_p2 = scmp.ne.s32.totalorder %s683_s6, %s454_s21  ;;  %s53_s18 = int_to_ptr.vmem [resolvable:$true] %s52_s18 }
  0x25   :  { %p458_p3 = scmp.lt.u32.totalorder %s454_s21, %s683_s6 }
  0x27   :  { %p460_p4 = pnand %p458_p3, %p455_p2 }
  0x29   :  { %463 = shalt.err (!%p460_p4)
}
  0x2a   :  { %s464_s26 = scalar_lea.vmem %s53_s18, 512  ;;  %p469_p6 = scmp.lt.s32.totalorder %s53_s18, %s53_s18 }
  0x2b   :  { %p465_p5 = scmp.ne.s32.totalorder %s53_s18, %s464_s26  ;;  %p470_p7 = scmp.lt.s32.totalorder %s464_s26, %s464_s26 }
  0x2d   :  { %p471_p8 = por %p470_p7, %p469_p6 }
  0x2f   :  { %p472_p9 = pnand %p471_p8, %p465_p5 }
  0x31   :  { %475 = shalt.err (!%p472_p9)
}
  0x32   :  { %s531_s0 = smov 128   ;;  %s532_s16 = smov 8  }
  0x33   :  { %58 = dma.hbm_to_vmem [thread:$0]  %s683_s6, 512, %s53_s18, [#allocation6], %s531_s0, %s531_s0, %s532_s16  }
  0x34   :  { %s533_s29 = smov [#allocation8]   ;;  %s476_s13 = scalar_lea.hbm %s685_s8, 512 }
  0x35   :  { %s66_s30 = sshll.u32 %s533_s29, 4  ;;  %p477_p10 = scmp.ne.s32.totalorder %s685_s8, %s476_s13  ;;  %s67_s30 = int_to_ptr.vmem [resolvable:$true] %s66_s30 }
  0x36   :  { %p480_p11 = scmp.lt.u32.totalorder %s476_s13, %s685_s8 }
  0x38   :  { %p482_p12 = pnand %p480_p11, %p477_p10 }
  0x3a   :  { %485 = shalt.err (!%p482_p12)
}
  0x3b   :  { %s486_s19 = scalar_lea.vmem %s67_s30, 512  ;;  %p491_p0 = scmp.lt.s32.totalorder %s67_s30, %s67_s30 }
  0x3c   :  { %p487_p13 = scmp.ne.s32.totalorder %s67_s30, %s486_s19  ;;  %p492_p1 = scmp.lt.s32.totalorder %s486_s19, %s486_s19 }
  0x3e   :  { %p493_p2 = por %p492_p1, %p491_p0 }
  0x40   :  { %p494_p3 = pnand %p493_p2, %p487_p13 }
  0x42   :  { %497 = shalt.err (!%p494_p3)
}
  0x43   :  { %72 = dma.hbm_to_vmem [thread:$0]  %s685_s8, 512, %s67_s30, [#allocation9], %s531_s0, %s531_s0, %s532_s16  }
  0x44   :  { %520 = dma.done.wait [#allocation3], 128  }
  0x45   :  { %521 = vsyncadd [#allocation3], 4294967168 }
  0x46   :  { %522 = dma.done.wait [#allocation6], 640  }
  0x47   :  { %523 = vsyncadd [#allocation6], 4294966656 }
  0x48   :  { %524 = dma.done.wait [#allocation9], 512  }
  0x49   :  { %525 = vsyncadd [#allocation9], 4294966784  ;;  %vm91_vm0 = vcmask 261120   ;;  %v87_v0 = vld [vmem:[#allocation2] sm:$0xff]  ;;  %v88_v1 = vld [vmem:[#allocation5] sm:$0xff]  ;;  %v534_v11 = vmov 0.0|0.0  }
  0x4a   :  { %v92_v2 = vsel %vm91_vm0, %v87_v0, 0.0  ;;  %v96_v3 = vmul.f32 %v87_v0, %v87_v0  ;;  %v128_v4 = vmul.f32 %v88_v1, %v88_v1  ;;  %v124_v6 = vsel %vm91_vm0, %v88_v1, 0.0  ;;  %v155_v8 = vld [vmem:[#allocation7] sm:$0xff]  ;;  %v156_v9 = vld [vmem:[#allocation7 + $0x8] sm:$0xff]  ;;  %v157_v10 = vld [vmem:[#allocation7 + $0x10] sm:$0xff]  ;;  %382 = vmatprep.subr.bf16.mxu0 %v534_v11  ;;  %388 = vmatprep.subr.bf16.mxu1 %v534_v11  ;;  %s537_s0 = smov [#allocation10]  }
  0x4b   :  { %93 = vadd.xlane.f32.xlu0 %v92_v2  ;;  %v383_v12 = vpack.c.bf16 %v156_v9, %v155_v8  ;;  %v158_v13 = vld [vmem:[#allocation7 + $0x18] sm:$0xff]  ;;  %vm535_vm1 = vmmov 0   ;;  %v536_v14 = vmov 0.0   ;;  %v342_v35 = vld [vmem:[%s679_s2] ss:$0 sm:$0xff]  ;;  %v240_v47 = vld [vmem:[#allocation8] sm:$0xff] }
  0x4c   :  { %v97_v5 = vsel %vm91_vm0, %v96_v3, 0.0  ;;  %v129_v7 = vsel %vm91_vm0, %v128_v4, 0.0  ;;  %368 = vmatprep.mubr.msk.f32.mxu0 %vm535_vm1, %v536_v14  ;;  %379 = vmatprep.mubr.msk.f32.mxu1 %vm535_vm1, %v536_v14  ;;  %v386_v15 = vpack.c.bf16 %v158_v13, %v157_v10  ;;  %v344_v38 = vld [vmem:[%s681_s4] ss:$0 sm:$0xff]  ;;  %v241_v48 = vld [vmem:[#allocation8 + $0x8] sm:$0xff]  ;;  %v243_v51 = vld [vmem:[#allocation8 + $0x18] sm:$0xff] }
  0x4d   :  { %98 = vadd.xlane.f32.xlu1 %v97_v5  ;;  %384 = vmatpush3.bf16.msra.mxu0 %v383_v12  ;;  %v343_v41 = vld [vmem:[%s680_s3] ss:$0 sm:$0xff]  ;;  %v389_v50 = vpack.c.bf16 %v241_v48, %v240_v47  ;;  %s331_s16 = sshll.u32 %s537_s0, 4  ;;  %s332_s16 = int_to_ptr.vmem [resolvable:$true] %s331_s16 }
  0x4e   :  { %385 = vmatprep.subr.bf16.mxu0 %v534_v11  ;;  %v345_v42 = vld [vmem:[%s682_s5] ss:$0 sm:$0xff]  ;;  %s498_s27 = scalar_lea.vmem %s332_s16, 128  ;;  %p503_p5 = scmp.lt.s32.totalorder %s332_s16, %s332_s16 }
  0x4f   :  { %125 = vadd.xlane.f32.xlu0 %v124_v6  ;;  %v242_v49 = vld [vmem:[#allocation8 + $0x10] sm:$0xff]  ;;  %390 = vmatpush3.bf16.msra.mxu1 %v389_v50  ;;  %p499_p4 = scmp.ne.s32.totalorder %s332_s16, %s498_s27  ;;  %p504_p6 = scmp.lt.s32.totalorder %s498_s27, %s498_s27 }
  0x50   :  { %v392_v52 = vpack.c.bf16 %v243_v51, %v242_v49  ;;  %391 = vmatprep.subr.bf16.mxu1 %v534_v11  ;;  %v346_v53 = vld [vmem:[%s684_s7] ss:$0 sm:$0xff] }
  0x51   :  { %130 = vadd.xlane.f32.xlu1 %v129_v7  ;;  %387 = vmatpush3.bf16.msra.mxu0 %v386_v15  ;;  %v348_v58 = vld [vmem:[%s686_s9] ss:$0 sm:$0xff]  ;;  %p505_p7 = por %p504_p6, %p503_p5 }
  0x53   :  { %393 = vmatpush3.bf16.msra.mxu1 %v392_v52  ;;  %p506_p8 = pnand %p505_p7, %p499_p4 }
  0xd8   :  { %v94_v16 = vpop.xlane.xlu0 %93 }
  0xd9   :  { %v95_v17 = vmul.f32 0.03125, %v94_v16 }
  0xda   :  { %v99_v18 = vpop.xlane.xlu1 %98 }
  0xdb   :  { %v101_v19 = vmul.f32 %v95_v17, %v95_v17  ;;  %v100_v20 = vmul.f32 0.03125, %v99_v18  ;;  %v104_v32 = vsub.f32 %v87_v0, %v95_v17 }
  0xdc   :  { %v126_v21 = vpop.xlane.xlu0 %125 }
  0xdd   :  { %v102_v22 = vsub.f32 %v100_v20, %v101_v19  ;;  %v127_v23 = vmul.f32 0.03125, %v126_v21 }
  0xde   :  { %v131_v24 = vpop.xlane.xlu1 %130 }
  0xdf   :  { %v103_v25 = vmax.f32 %v102_v22, 0.0  ;;  %v133_v26 = vmul.f32 %v127_v23, %v127_v23  ;;  %v132_v27 = vmul.f32 0.03125, %v131_v24  ;;  %v136_v36 = vsub.f32 %v88_v1, %v127_v23 }
  0xe1   :  { %v105_v28 = vadd.f32 1e-05, %v103_v25  ;;  %v134_v29 = vsub.f32 %v132_v27, %v133_v26 }
  0xe3   :  { %404 = vrsqrt.f32 %v105_v28  ;;  %v135_v30 = vmax.f32 %v134_v29, 0.0 }
  0xe5   :  { %v137_v31 = vadd.f32 1e-05, %v135_v30 }
  0xe7   :  { %406 = vrsqrt.f32 %v137_v31 }
  0xed   :  { %v405_v33 = vpop.eup %404 }
  0xee   :  { %v107_v34 = vmul.f32 %v405_v33, %v104_v32 }
  0xf0   :  { %v114_v39 = vmul.f32 %v342_v35, %v107_v34 }
  0xf1   :  { %v407_v37 = vpop.eup %406 }
  0xf2   :  { %v139_v40 = vmul.f32 %v407_v37, %v136_v36  ;;  %v121_v44 = vadd.f32 %v343_v41, %v114_v39 }
  0xf4   :  { %v146_v43 = vmul.f32 %v344_v38, %v139_v40 }
  0xf6   :  { %v153_v45 = vadd.f32 %v345_v42, %v146_v43 }
  0xf8   :  { %v154_v46 = vadd.f32 %v153_v45, %v121_v44 }
  0xfa   :  { %369 = vmatmul.mubr.msk.f32.vlgmr.msra.gmra.mrb[0].mxu0 %vm91_vm0, %v154_v46 }
 0x1cd   :  { %v235_v54 = vpop.f32.mrb[0].mxu0 }
 0x1ce   :  { %v236_v55 = vadd.f32 %v346_v53, %v235_v54  ;;  %v370_v56 = vpop.f32.mrb[1].mxu0 }
 0x1d0   :  { %408 = vtanh.f32 %v236_v55 }
 0x1da   :  { %v409_v57 = vpop.eup %408 }
 0x1db   :  { %380 = vmatmul.mubr.msk.f32.vlgmr.msra.gmra.mrb[0].mxu1 %vm91_vm0, %v409_v57 }
 0x2ae   :  { %v320_v59 = vpop.f32.mrb[0].mxu1 }
 0x2af   :  { %v321_v60 = vadd.f32 %v348_v58, %v320_v59  ;;  %v381_v61 = vpop.f32.mrb[1].mxu1 }
 0x2b1   :  { %324 = vst [vmem:[#allocation10] sm:$0xff] %v321_v60 }
 0x2b2   :  { %509 = shalt.err (!%p506_p8)
}
 0x2b3   :  { %s510_s29 = scalar_lea.hbm %s687_s10, 128 }
 0x2b4   :  { %p511_p9 = scmp.ne.s32.totalorder %s687_s10, %s510_s29  ;;  %p514_p10 = scmp.lt.u32.totalorder %s510_s29, %s687_s10 }
 0x2b6   :  { %p516_p11 = pnand %p514_p10, %p511_p9 }
 0x2b8   :  { %519 = shalt.err (!%p516_p11)
}
 0x2b9   :  { %334 = dma.vmem_to_hbm [thread:$0]  %s332_s16, 128, %s687_s10, [#allocation4]  }
 0x2ba   :  { %526 = dma.done.wait [#allocation4], 128  }
 0x2bb   :  { %527 = vsyncadd [#allocation4], 4294967168 }
 0x2bc   :  { %338 = vsyncpa [#allocation3], 1 }
 0x2bd   :  { %339 = vsyncpa [#allocation6], 1 }
 0x2be   :  { %340 = vsyncpa [#allocation9], 1 }
 0x2bf   :  { %341 = vsyncpa [#allocation4], 1 }

</bundles_post_ra>
